<compile_context>
chip_gen: v5e
topology: v5e:2x2
jax: 0.10.0
libtpu: 0.0.40
codegen_flags: <defaults>
</compile_context>

<pallas_src>
import jax
import jax.numpy as jnp
from jax.experimental import pallas as pl
from jax.experimental.pallas import tpu as pltpu

_LANE = 128              # vreg lane width
_ROW_ALIGN = 16          # sublane packing (bf16-safe; also valid for f32)
_MIN_PIPELINE_STEPS = 4  # >=2 steps per TC on v7x (2 TCs); 3-4 steps on v5e/v6e


def _round_up(x, m):
    return (x + m - 1) // m * m


def _score_kernel(s_ref, w1_ref, b1_ref, w2_ref, b2_ref, w3_ref, b3_ref, o_ref):
    """One row-tile of the fused ScoreLayer forward.

    Matmul operands go to the MXU in their stored dtype (bf16 at native rate,
    f32 at full precision); accumulation is always f32.  Biases arrive as f32;
    the residual add is done in f32.
    """
    x = s_ref[...]                       # (TM, D_in), native dtype
    mxu_dtype = x.dtype

    # linear_1 + ReLU
    h = jnp.dot(x, w1_ref[...], preferred_element_type=jnp.float32)
    h = jnp.maximum(h + b1_ref[...], 0.0)

    # linear_2 + residual (dim_in == dim_hid in this module)
    h = jnp.dot(h.astype(mxu_dtype), w2_ref[...],
                preferred_element_type=jnp.float32)
    h = h + b2_ref[...] + x.astype(jnp.float32)

    # linear_3
    out = jnp.dot(h.astype(mxu_dtype), w3_ref[...],
                  preferred_element_type=jnp.float32)
    out = out + b3_ref[...]

    o_ref[...] = out.astype(o_ref.dtype)


def _default_vmem_limit_bytes():
    """~55% of physical VMEM (generation-aware), leaving headroom for Mosaic's
    internal scratch.  Falls back to the smallest per-core VMEM (v7x: 64 MiB)
    if the query is unavailable."""
    try:
        cap = getattr(pltpu.get_tpu_info(), "vmem_capacity_bytes", None)
    except Exception:
        cap = None
    if not cap:
        cap = 64 * 1024 * 1024
    return int(min(cap * 0.55, 96 * 1024 * 1024))


def _choose_tm(n, dim_in, dim_hid, dim_out_eff, act_bytes, budget_bytes):
    """Largest row tile fitting the VMEM budget (<=1024 rows), then capped so
    the grid has >= _MIN_PIPELINE_STEPS steps when there is enough work."""
    # Per-row VMEM: double-buffered input+output tiles (act dtype), f32
    # intermediates (h, residual copy, out) and re-cast MXU-feed copies.
    row_bytes = ((2 * dim_in + 2 * dim_out_eff + 2 * dim_hid) * act_bytes
                 + (2 * dim_hid + dim_in + dim_out_eff) * 4)
    # Grid-invariant weights/biases: budget for double buffering (worst case
    # if the single-buffer request is not honoured).
    w_elems = dim_in * dim_hid + dim_hid * dim_hid + dim_hid * dim_out_eff
    fixed_bytes = 2 * (w_elems * act_bytes + (2 * dim_hid + dim_out_eff) * 4)

    cap_rows = max(_ROW_ALIGN, (budget_bytes - fixed_bytes) // max(row_bytes, 1))
    tm = int(min(cap_rows, 1024, _round_up(n, _ROW_ALIGN)))
    tm = max(_ROW_ALIGN, (tm // _ROW_ALIGN) * _ROW_ALIGN)

    # Enough grid steps for DMA/compute overlap per TC and for both v7x TCs.
    if n >= _MIN_PIPELINE_STEPS * 128:
        tm = min(tm, max(_ROW_ALIGN,
                         _round_up(pl.cdiv(n, _MIN_PIPELINE_STEPS), _ROW_ALIGN)))
    return tm


def score_layer_pallas(s, w1, b1, w2, b2, w3, b3, *, tm=None,
                       vmem_limit_bytes=None):
    """ScoreLayer forward.

    s: (..., dim_in) in f32 or bf16 -- its dtype is used end-to-end (supply
    bf16 from the producer to halve HBM traffic and double MXU rate).
    Weights are stored (in, out) (i.e. PyTorch weight.T); biases are (out,).
    Returns (..., dim_out) in s.dtype.
    """
    orig_shape = s.shape
    dim_in = orig_shape[-1]
    dim_hid = w1.shape[1]
    dim_out = w3.shape[1]
    assert dim_in == dim_hid, "residual add requires dim_in == dim_hid"

    act_dtype = s.dtype
    act_bytes = jnp.dtype(act_dtype).itemsize

    s2d = s.reshape(-1, dim_in)          # no dtype conversion, no row padding
    n = s2d.shape[0]

    # Conditional lane padding of the output features: only when the extra HBM
    # writeback (+ post-kernel slice) is <= 12.5% -- the kernel is HBM-bound.
    dim_out_pad = _round_up(dim_out, _LANE)
    use_pad = dim_out_pad != dim_out and (dim_out_pad - dim_out) * 8 <= dim_out
    dim_out_eff = dim_out_pad if use_pad else dim_out

    # Weights in the activation dtype (tiny one-time cast; a no-op when the
    # producer already supplies matching dtypes).  Biases stay f32 in-kernel.
    w1c = w1.astype(act_dtype)
    w2c = w2.astype(act_dtype)
    w3c = w3.astype(act_dtype)
    b1c = b1.reshape(1, dim_hid).astype(jnp.float32)
    b2c = b2.reshape(1, dim_hid).astype(jnp.float32)
    b3c = b3.reshape(1, dim_out).astype(jnp.float32)
    if use_pad:
        w3c = jnp.pad(w3c, ((0, 0), (0, dim_out_eff - dim_out)))
        b3c = jnp.pad(b3c, ((0, 0), (0, dim_out_eff - dim_out)))

    if vmem_limit_bytes is None:
        vmem_limit_bytes = _default_vmem_limit_bytes()
    if tm is None:
        budget = max(4 * 1024 * 1024, vmem_limit_bytes - 8 * 1024 * 1024)
        tm = _choose_tm(n, dim_in, dim_hid, dim_out_eff, act_bytes, budget)
    grid_m = pl.cdiv(n, tm)

    w_elems = dim_in * dim_hid + dim_hid * dim_hid + dim_hid * dim_out_eff
    cost = pl.CostEstimate(
        flops=2 * n * w_elems,
        transcendentals=0,
        bytes_accessed=(n * (dim_in + dim_out_eff) * act_bytes
                        + w_elems * act_bytes
                        + (2 * dim_hid + dim_out_eff) * 4),
    )

    def call(single_buffer_weights):
        def wspec(shape):
            if single_buffer_weights:
                return pl.BlockSpec(shape, lambda i: (0, 0),
                                    pipeline_mode=pl.Buffered(1))
            return pl.BlockSpec(shape, lambda i: (0, 0))

        return pl.pallas_call(
            _score_kernel,
            out_shape=jax.ShapeDtypeStruct((n, dim_out_eff), act_dtype),
            grid_spec=pltpu.PrefetchScalarGridSpec(
                num_scalar_prefetch=0,
                grid=(grid_m,),
                in_specs=[
                    pl.BlockSpec((tm, dim_in), lambda i: (i, 0)),   # s tile
                    wspec((dim_in, dim_hid)),                       # W1
                    wspec((1, dim_hid)),                            # b1
                    wspec((dim_hid, dim_hid)),                      # W2
                    wspec((1, dim_hid)),                            # b2
                    wspec((dim_hid, dim_out_eff)),                  # W3
                    wspec((1, dim_out_eff)),                        # b3
                ],
                out_specs=pl.BlockSpec((tm, dim_out_eff), lambda i: (i, 0)),
            ),
            compiler_params=pltpu.CompilerParams(
                dimension_semantics=("parallel",),
                vmem_limit_bytes=vmem_limit_bytes,
            ),
            cost_estimate=cost,
        )(s2d, w1c, b1c, w2c, b2c, w3c, b3c)

    try:
        out = call(single_buffer_weights=True)
    except Exception:
        # Some builds reject per-operand pipeline_mode on TPU pallas_call;
        # default double-buffering is already accounted for in the VMEM budget.
        out = call(single_buffer_weights=False)

    if use_pad:
        out = out[:, :dim_out]
    return out.reshape(*orig_shape[:-1], dim_out)


def init_params(key, dim_in, dim_hid, dim_out, dtype=jnp.float32):
    """Parameter shapes matching the module; std-scaled normal init.

    linear_1: he-style (2/fan_in), linear_2: lecun-style (1/fan_in).
    linear_3 has init='final' (zeros) in the module; a small random init is
    used here so the kernel output is non-trivial for testing.
    (Exact scipy truncated-normal sampling is not reproduced.)
    """
    k1, k2, k3 = jax.random.split(key, 3)
    w1 = jax.random.normal(k1, (dim_in, dim_hid), dtype) * jnp.sqrt(2.0 / dim_in)
    b1 = jnp.zeros((dim_hid,), dtype)
    w2 = jax.random.normal(k2, (dim_hid, dim_hid), dtype) * jnp.sqrt(1.0 / dim_hid)
    b2 = jnp.zeros((dim_hid,), dtype)
    w3 = jax.random.normal(k3, (dim_hid, dim_out), dtype) * 0.02
    b3 = jnp.zeros((dim_out,), dtype)
    return w1, b1, w2, b2, w3, b3


def score_layer_ref(s, w1, b1, w2, b2, w3, b3):
    s0 = s
    h = jnp.maximum(s @ w1 + b1, 0.0)
    h = h @ w2 + b2
    h = h + s0
    return h @ w3 + b3


if __name__ == "__main__":
    key = jax.random.PRNGKey(0)
    k_x, k_p, k_x2 = jax.random.split(key, 3)

    batch, seq = 2, 8
    dim_in = dim_hid = 32
    dim_out = 16

    s = jax.random.normal(k_x, (batch, seq, dim_in), jnp.float32)
    params = init_params(k_p, dim_in, dim_hid, dim_out)

    # 1) f32 end-to-end, small shapes.
    out = jax.block_until_ready(score_layer_pallas(s, *params))
    ref = score_layer_ref(s, *params)
    assert out.shape == (batch, seq, dim_out)
    assert out.dtype == jnp.float32
    assert jnp.allclose(out, ref, atol=1e-4, rtol=1e-4), "f32 mismatch vs reference"

    # 2) bf16 producer path: caller supplies bf16 activations/weights; the
    #    kernel feeds bf16 straight to the MXU (f32 accumulation inside).
    s_bf = s.astype(jnp.bfloat16)
    params_bf = tuple(p.astype(jnp.bfloat16) for p in params)
    out_bf = jax.block_until_ready(score_layer_pallas(s_bf, *params_bf))
    q = lambda a: a.astype(jnp.bfloat16).astype(jnp.float32)
    ref_q = score_layer_ref(q(s), *(q(p) for p in params))
    assert out_bf.dtype == jnp.bfloat16
    assert jnp.allclose(out_bf.astype(jnp.float32), ref_q, atol=5e-2, rtol=5e-2), \
        "bf16 mismatch vs quantized reference"

    # 3) Ragged token count: exercises cdiv grid, multi-step pipeline, and the
    #    partial last block (no wrapper-side row padding).
    s_big = jax.random.normal(k_x2, (4, 333, dim_in), jnp.float32)
    out_big = jax.block_until_ready(score_layer_pallas(s_big, *params))
    ref_big = score_layer_ref(s_big, *params)
    assert out_big.shape == (4, 333, dim_out)
    assert jnp.allclose(out_big, ref_big, atol=1e-4, rtol=1e-4), "ragged mismatch"

    print("KERNEL_OK")
</pallas_src>

<mosaic_0001>
module attributes {stable_mosaic.version = 11 : i64} {
  func.func @_score_kernel(%arg0: i32, %arg1: memref<16x32xf32, #tpu.memory_space<vmem>>, %arg2: memref<32x32xf32, #tpu.memory_space<vmem>>, %arg3: memref<1x32xf32, #tpu.memory_space<vmem>>, %arg4: memref<32x32xf32, #tpu.memory_space<vmem>>, %arg5: memref<1x32xf32, #tpu.memory_space<vmem>>, %arg6: memref<32x16xf32, #tpu.memory_space<vmem>>, %arg7: memref<1x16xf32, #tpu.memory_space<vmem>>, %arg8: memref<16x16xf32, #tpu.memory_space<vmem>>) attributes {dimension_semantics = [#tpu.dimension_semantics<parallel>], iteration_bounds = array<i64: 1>, scalar_prefetch = 0 : i64, scratch_operands = 0 : i64, tpu.core_type = #tpu.core_type<tc>, window_params = [{transform_indices = @transform_0, window_bounds = array<i64: 16, 32>}, {pipeline_mode = #tpu.pipeline_mode<synchronous>, transform_indices = @transform_1, window_bounds = array<i64: 32, 32>}, {pipeline_mode = #tpu.pipeline_mode<synchronous>, transform_indices = @transform_2, window_bounds = array<i64: 1, 32>}, {pipeline_mode = #tpu.pipeline_mode<synchronous>, transform_indices = @transform_3, window_bounds = array<i64: 32, 32>}, {pipeline_mode = #tpu.pipeline_mode<synchronous>, transform_indices = @transform_4, window_bounds = array<i64: 1, 32>}, {pipeline_mode = #tpu.pipeline_mode<synchronous>, transform_indices = @transform_5, window_bounds = array<i64: 32, 16>}, {pipeline_mode = #tpu.pipeline_mode<synchronous>, transform_indices = @transform_6, window_bounds = array<i64: 1, 16>}, {transform_indices = @transform_7, window_bounds = array<i64: 16, 16>}]} {
    %c0 = arith.constant 0 : index
    %c0_0 = arith.constant 0 : index
    %0 = vector.load %arg1[%c0, %c0_0] : memref<16x32xf32, #tpu.memory_space<vmem>>, vector<16x32xf32>
    %c0_1 = arith.constant 0 : index
    %c0_2 = arith.constant 0 : index
    %1 = vector.load %arg2[%c0_1, %c0_2] : memref<32x32xf32, #tpu.memory_space<vmem>>, vector<32x32xf32>
    %cst = arith.constant dense<0.000000e+00> : vector<16x32xf32>
    %2 = tpu.matmul %0, %1, %cst {dimension_numbers = #tpu.dot_dimension_numbers<[1], [0], [0], [1], [0, 0, 1, 1], [], []>} : vector<16x32xf32>, vector<32x32xf32>, vector<16x32xf32> -> vector<16x32xf32>
    %c0_3 = arith.constant 0 : index
    %c0_4 = arith.constant 0 : index
    %3 = vector.load %arg3[%c0_3, %c0_4] : memref<1x32xf32, #tpu.memory_space<vmem>>, vector<1x32xf32>
    %4 = vector.broadcast %3 : vector<1x32xf32> to vector<16x32xf32>
    %5 = arith.addf %2, %4 : vector<16x32xf32>
    %cst_5 = arith.constant 0.000000e+00 : f32
    %6 = vector.broadcast %cst_5 : f32 to vector<16x32xf32>
    %7 = arith.maximumf %5, %6 : vector<16x32xf32>
    %c0_6 = arith.constant 0 : index
    %c0_7 = arith.constant 0 : index
    %8 = vector.load %arg4[%c0_6, %c0_7] : memref<32x32xf32, #tpu.memory_space<vmem>>, vector<32x32xf32>
    %cst_8 = arith.constant dense<0.000000e+00> : vector<16x32xf32>
    %9 = tpu.matmul %7, %8, %cst_8 {dimension_numbers = #tpu.dot_dimension_numbers<[1], [0], [0], [1], [0, 0, 1, 1], [], []>} : vector<16x32xf32>, vector<32x32xf32>, vector<16x32xf32> -> vector<16x32xf32>
    %c0_9 = arith.constant 0 : index
    %c0_10 = arith.constant 0 : index
    %10 = vector.load %arg5[%c0_9, %c0_10] : memref<1x32xf32, #tpu.memory_space<vmem>>, vector<1x32xf32>
    %11 = vector.broadcast %10 : vector<1x32xf32> to vector<16x32xf32>
    %12 = arith.addf %9, %11 : vector<16x32xf32>
    %13 = arith.addf %12, %0 : vector<16x32xf32>
    %c0_11 = arith.constant 0 : index
    %c0_12 = arith.constant 0 : index
    %14 = vector.load %arg6[%c0_11, %c0_12] : memref<32x16xf32, #tpu.memory_space<vmem>>, vector<32x16xf32>
    %cst_13 = arith.constant dense<0.000000e+00> : vector<16x16xf32>
    %15 = tpu.matmul %13, %14, %cst_13 {dimension_numbers = #tpu.dot_dimension_numbers<[1], [0], [0], [1], [0, 0, 1, 1], [], []>} : vector<16x32xf32>, vector<32x16xf32>, vector<16x16xf32> -> vector<16x16xf32>
    %c0_14 = arith.constant 0 : index
    %c0_15 = arith.constant 0 : index
    %16 = vector.load %arg7[%c0_14, %c0_15] : memref<1x16xf32, #tpu.memory_space<vmem>>, vector<1x16xf32>
    %17 = vector.broadcast %16 : vector<1x16xf32> to vector<16x16xf32>
    %18 = arith.addf %15, %17 : vector<16x16xf32>
    %c0_16 = arith.constant 0 : index
    %c0_17 = arith.constant 0 : index
    %19 = vector.load %arg8[%c0_16, %c0_17] : memref<16x16xf32, #tpu.memory_space<vmem>>, vector<16x16xf32>
    tpu.vector_store %arg8[%c0_16, %c0_17], %18 {strides = array<i32>} : memref<16x16xf32, #tpu.memory_space<vmem>>, vector<16x16xf32>,
    return
  }
  func.func @transform_0(%arg0: i32) -> (i32, i32) {
    %c0_i32 = arith.constant 0 : i32
    %c0_i32_0 = arith.constant 0 : i32
    return %arg0, %c0_i32 : i32, i32
  }
  func.func @transform_1(%arg0: i32) -> (i32, i32) {
    %c0_i32 = arith.constant 0 : i32
    %c0_i32_0 = arith.constant 0 : i32
    %c0_i32_1 = arith.constant 0 : i32
    return %c0_i32, %c0_i32_0 : i32, i32
  }
  func.func @transform_2(%arg0: i32) -> (i32, i32) {
    %c0_i32 = arith.constant 0 : i32
    %c0_i32_0 = arith.constant 0 : i32
    %c0_i32_1 = arith.constant 0 : i32
    return %c0_i32, %c0_i32_0 : i32, i32
  }
  func.func @transform_3(%arg0: i32) -> (i32, i32) {
    %c0_i32 = arith.constant 0 : i32
    %c0_i32_0 = arith.constant 0 : i32
    %c0_i32_1 = arith.constant 0 : i32
    return %c0_i32, %c0_i32_0 : i32, i32
  }
  func.func @transform_4(%arg0: i32) -> (i32, i32) {
    %c0_i32 = arith.constant 0 : i32
    %c0_i32_0 = arith.constant 0 : i32
    %c0_i32_1 = arith.constant 0 : i32
    return %c0_i32, %c0_i32_0 : i32, i32
  }
  func.func @transform_5(%arg0: i32) -> (i32, i32) {
    %c0_i32 = arith.constant 0 : i32
    %c0_i32_0 = arith.constant 0 : i32
    %c0_i32_1 = arith.constant 0 : i32
    return %c0_i32, %c0_i32_0 : i32, i32
  }
  func.func @transform_6(%arg0: i32) -> (i32, i32) {
    %c0_i32 = arith.constant 0 : i32
    %c0_i32_0 = arith.constant 0 : i32
    %c0_i32_1 = arith.constant 0 : i32
    return %c0_i32, %c0_i32_0 : i32, i32
  }
  func.func @transform_7(%arg0: i32) -> (i32, i32) {
    %c0_i32 = arith.constant 0 : i32
    %c0_i32_0 = arith.constant 0 : i32
    return %arg0, %c0_i32 : i32, i32
  }
}

module attributes {stable_mosaic.version = 11 : i64} {
  func.func @_score_kernel(%arg0: i32, %arg1: memref<16x32xf32, #tpu.memory_space<vmem>>, %arg2: memref<32x32xf32, #tpu.memory_space<vmem>>, %arg3: memref<1x32xf32, #tpu.memory_space<vmem>>, %arg4: memref<32x32xf32, #tpu.memory_space<vmem>>, %arg5: memref<1x32xf32, #tpu.memory_space<vmem>>, %arg6: memref<32x16xf32, #tpu.memory_space<vmem>>, %arg7: memref<1x16xf32, #tpu.memory_space<vmem>>, %arg8: memref<16x16xf32, #tpu.memory_space<vmem>>) attributes {dimension_semantics = [#tpu.dimension_semantics<parallel>], iteration_bounds = array<i64: 1>, scalar_prefetch = 0 : i64, scratch_operands = 0 : i64, tpu.core_type = #tpu.core_type<tc>, window_params = [{transform_indices = @transform_0, window_bounds = array<i64: 16, 32>}, {pipeline_mode = #tpu.pipeline_mode<synchronous>, transform_indices = @transform_1, window_bounds = array<i64: 32, 32>}, {pipeline_mode = #tpu.pipeline_mode<synchronous>, transform_indices = @transform_2, window_bounds = array<i64: 1, 32>}, {pipeline_mode = #tpu.pipeline_mode<synchronous>, transform_indices = @transform_3, window_bounds = array<i64: 32, 32>}, {pipeline_mode = #tpu.pipeline_mode<synchronous>, transform_indices = @transform_4, window_bounds = array<i64: 1, 32>}, {pipeline_mode = #tpu.pipeline_mode<synchronous>, transform_indices = @transform_5, window_bounds = array<i64: 32, 16>}, {pipeline_mode = #tpu.pipeline_mode<synchronous>, transform_indices = @transform_6, window_bounds = array<i64: 1, 16>}, {transform_indices = @transform_7, window_bounds = array<i64: 16, 16>}]} {
    %c0 = arith.constant 0 : index
    %c0_0 = arith.constant 0 : index
    %0 = vector.load %arg1[%c0, %c0_0] : memref<16x32xf32, #tpu.memory_space<vmem>>, vector<16x32xf32>
    %c0_1 = arith.constant 0 : index
    %c0_2 = arith.constant 0 : index
    %1 = vector.load %arg2[%c0_1, %c0_2] : memref<32x32xf32, #tpu.memory_space<vmem>>, vector<32x32xf32>
    %cst = arith.constant dense<0.000000e+00> : vector<16x32xf32>
    %2 = tpu.matmul %0, %1, %cst {dimension_numbers = #tpu.dot_dimension_numbers<[1], [0], [0], [1], [0, 0, 1, 1], [], []>} : vector<16x32xf32>, vector<32x32xf32>, vector<16x32xf32> -> vector<16x32xf32>
    %c0_3 = arith.constant 0 : index
    %c0_4 = arith.constant 0 : index
    %3 = vector.load %arg3[%c0_3, %c0_4] : memref<1x32xf32, #tpu.memory_space<vmem>>, vector<1x32xf32>
    %4 = vector.broadcast %3 : vector<1x32xf32> to vector<16x32xf32>
    %5 = arith.addf %2, %4 : vector<16x32xf32>
    %cst_5 = arith.constant 0.000000e+00 : f32
    %6 = vector.broadcast %cst_5 : f32 to vector<16x32xf32>
    %7 = arith.maximumf %5, %6 : vector<16x32xf32>
    %c0_6 = arith.constant 0 : index
    %c0_7 = arith.constant 0 : index
    %8 = vector.load %arg4[%c0_6, %c0_7] : memref<32x32xf32, #tpu.memory_space<vmem>>, vector<32x32xf32>
    %cst_8 = arith.constant dense<0.000000e+00> : vector<16x32xf32>
    %9 = tpu.matmul %7, %8, %cst_8 {dimension_numbers = #tpu.dot_dimension_numbers<[1], [0], [0], [1], [0, 0, 1, 1], [], []>} : vector<16x32xf32>, vector<32x32xf32>, vector<16x32xf32> -> vector<16x32xf32>
    %c0_9 = arith.constant 0 : index
    %c0_10 = arith.constant 0 : index
    %10 = vector.load %arg5[%c0_9, %c0_10] : memref<1x32xf32, #tpu.memory_space<vmem>>, vector<1x32xf32>
    %11 = vector.broadcast %10 : vector<1x32xf32> to vector<16x32xf32>
    %12 = arith.addf %9, %11 : vector<16x32xf32>
    %13 = arith.addf %12, %0 : vector<16x32xf32>
    %c0_11 = arith.constant 0 : index
    %c0_12 = arith.constant 0 : index
    %14 = vector.load %arg6[%c0_11, %c0_12] : memref<32x16xf32, #tpu.memory_space<vmem>>, vector<32x16xf32>
    %cst_13 = arith.constant dense<0.000000e+00> : vector<16x16xf32>
    %15 = tpu.matmul %13, %14, %cst_13 {dimension_numbers = #tpu.dot_dimension_numbers<[1], [0], [0], [1], [0, 0, 1, 1], [], []>} : vector<16x32xf32>, vector<32x16xf32>, vector<16x16xf32> -> vector<16x16xf32>
    %c0_14 = arith.constant 0 : index
    %c0_15 = arith.constant 0 : index
    %16 = vector.load %arg7[%c0_14, %c0_15] : memref<1x16xf32, #tpu.memory_space<vmem>>, vector<1x16xf32>
    %17 = vector.broadcast %16 : vector<1x16xf32> to vector<16x16xf32>
    %18 = arith.addf %15, %17 : vector<16x16xf32>
    %c0_16 = arith.constant 0 : index
    %c0_17 = arith.constant 0 : index
    %19 = vector.load %arg8[%c0_16, %c0_17] : memref<16x16xf32, #tpu.memory_space<vmem>>, vector<16x16xf32>
    tpu.vector_store %arg8[%c0_16, %c0_17], %18 {strides = array<i32>} : memref<16x16xf32, #tpu.memory_space<vmem>>, vector<16x16xf32>,
    return
  }
  func.func @transform_0(%arg0: i32) -> (i32, i32) {
    %c0_i32 = arith.constant 0 : i32
    %c0_i32_0 = arith.constant 0 : i32
    return %arg0, %c0_i32 : i32, i32
  }
  func.func @transform_1(%arg0: i32) -> (i32, i32) {
    %c0_i32 = arith.constant 0 : i32
    %c0_i32_0 = arith.constant 0 : i32
    %c0_i32_1 = arith.constant 0 : i32
    return %c0_i32, %c0_i32_0 : i32, i32
  }
  func.func @transform_2(%arg0: i32) -> (i32, i32) {
    %c0_i32 = arith.constant 0 : i32
    %c0_i32_0 = arith.constant 0 : i32
    %c0_i32_1 = arith.constant 0 : i32
    return %c0_i32, %c0_i32_0 : i32, i32
  }
  func.func @transform_3(%arg0: i32) -> (i32, i32) {
    %c0_i32 = arith.constant 0 : i32
    %c0_i32_0 = arith.constant 0 : i32
    %c0_i32_1 = arith.constant 0 : i32
    return %c0_i32, %c0_i32_0 : i32, i32
  }
  func.func @transform_4(%arg0: i32) -> (i32, i32) {
    %c0_i32 = arith.constant 0 : i32
    %c0_i32_0 = arith.constant 0 : i32
    %c0_i32_1 = arith.constant 0 : i32
    return %c0_i32, %c0_i32_0 : i32, i32
  }
  func.func @transform_5(%arg0: i32) -> (i32, i32) {
    %c0_i32 = arith.constant 0 : i32
    %c0_i32_0 = arith.constant 0 : i32
    %c0_i32_1 = arith.constant 0 : i32
    return %c0_i32, %c0_i32_0 : i32, i32
  }
  func.func @transform_6(%arg0: i32) -> (i32, i32) {
    %c0_i32 = arith.constant 0 : i32
    %c0_i32_0 = arith.constant 0 : i32
    %c0_i32_1 = arith.constant 0 : i32
    return %c0_i32, %c0_i32_0 : i32, i32
  }
  func.func @transform_7(%arg0: i32) -> (i32, i32) {
    %c0_i32 = arith.constant 0 : i32
    %c0_i32_0 = arith.constant 0 : i32
    return %arg0, %c0_i32 : i32, i32
  }
}

</mosaic_0001>

<bundles_post_ra>
// kernel: tpu_custom_call.1
= control target key start
LH: loop header
LB: loop body
LE: loop exit
PB: predicated region body
PF: predicated region fallthrough
CT: control target
= control target key end

     0   :  { %12 = vsyncpa [#allocation3], 0  ;;  %s353_s0 = inlined_call_operand.vmem [shape: f32[16,32], index: 0, kind: input, shape index: {}]   ;;  %s354_s1 = inlined_call_operand.vmem [shape: f32[32,32], index: 1, kind: input, shape index: {}]   ;;  %s355_s2 = inlined_call_operand.vmem [shape: f32[1,32], index: 2, kind: input, shape index: {}]   ;;  %s356_s3 = inlined_call_operand.hbm [shape: f32[32,32], index: 3, kind: input, shape index: {}]   ;;  %s357_s4 = inlined_call_operand.vmem [shape: f32[1,32], index: 4, kind: input, shape index: {}]   ;;  %s358_s5 = inlined_call_operand.vmem [shape: f32[32,16], index: 5, kind: input, shape index: {}]   ;;  %s359_s6 = inlined_call_operand.vmem [shape: f32[1,16], index: 6, kind: input, shape index: {}]   ;;  %s360_s7 = inlined_call_operand.hbm [shape: f32[16,16], index: 7, kind: output, shape index: {}]  }
   0x1   :  { %13 = vsyncpa [#allocation4], 0  ;;  %s24_s26 = sshll.u32 %s356_s3, 4  ;;  %s252_s27 = smov [#allocation2]   ;;  %s25_s26 = int_to_ptr.hbm [resolvable:$true] %s24_s26 }
   0x2   :  { %s26_s28 = sshll.u32 %s252_s27, 4  ;;  %s253_s29 = smov 128   ;;  %s27_s28 = int_to_ptr.vmem [resolvable:$true] %s26_s28 }
   0x3   :  { %s254_s30 = smov 8  }
   0x4   :  { %32 = dma.hbm_to_vmem [thread:$0]  %s25_s26, 512, %s27_s28, [#allocation3], %s253_s29, %s253_s29, %s254_s30  }
   0x5   :  { %248 = dma.done.wait [#allocation3], 512  }
   0x6   :  { %249 = vsyncadd [#allocation3], 4294966784  ;;  %v48_v0 = vld [vmem:[%s354_s1 + $0x18] sm:$0xff]  ;;  %v47_v1 = vld [vmem:[%s354_s1 + $0x10] sm:$0xff]  ;;  %vm53_vm0 = vcmask 261120   ;;  %vm161_vm1 = vcmask 130048  }
   0x7   :  { %72 = vmatpush.msra.mxu0 %v48_v0  ;;  %189 = vmatpush.msra.mxu3 %v48_v0  ;;  %v46_v2 = vld [vmem:[%s354_s1 + $0x8] sm:$0xff]  ;;  %v88_v3 = vld [vmem:[#allocation2 + $0x18] sm:$0xff]  ;;  %v45_v4 = vld [vmem:[%s354_s1] sm:$0xff]  ;;  %s170_s11 = sshll.u32 %s360_s7, 4  ;;  %s171_s11 = int_to_ptr.hbm [resolvable:$true] %s170_s11 }
   0x8   :  { %111 = vmatpush.msra.mxu1 %v88_v3  ;;  %v43_v5 = vld [vmem:[%s353_s0] sm:$0xff]  ;;  %v44_v6 = vld [vmem:[%s353_s0 + $0x8] sm:$0xff]  ;;  %v87_v7 = vld [vmem:[#allocation2 + $0x10] sm:$0xff] }
   0x9   :  { %73 = vmatpush.msra.mxu0 %v47_v1  ;;  %190 = vmatpush.msra.mxu3 %v47_v1  ;;  %v86_v8 = vld [vmem:[#allocation2 + $0x8] sm:$0xff]  ;;  %v85_v9 = vld [vmem:[#allocation2] sm:$0xff]  ;;  %v127_v10 = vld [vmem:[%s358_s5 + $0x18] sm:$0xff] }
   0xa   :  { %112 = vmatpush.msra.mxu1 %v87_v7  ;;  %150 = vmatpush.msra.mxu2 %v127_v10  ;;  %v197_v11 = vld [vmem:[%s355_s2] ss:$0 sm:$0xff]  ;;  %v126_v18 = vld [vmem:[%s358_s5 + $0x10] sm:$0xff]  ;;  %v125_v19 = vld [vmem:[%s358_s5 + $0x8] sm:$0xff] }
   0xb   :  { %74 = vmatpush.msra.mxu0 %v46_v2  ;;  %191 = vmatpush.msra.mxu3 %v46_v2  ;;  %v124_v20 = vld [vmem:[%s358_s5] sm:$0xff]  ;;  %s255_s5 = smov [#allocation5]  }
   0xc   :  { %113 = vmatpush.msra.mxu1 %v86_v8  ;;  %151 = vmatpush.msra.mxu2 %v126_v18  ;;  %v198_v21 = vld [vmem:[%s357_s4] ss:$0 sm:$0xff]  ;;  %s168_s4 = sshll.u32 %s255_s5, 4  ;;  %s169_s4 = int_to_ptr.vmem [resolvable:$true] %s168_s4 }
   0xd   :  { %75 = vmatpush.msra.mxu0 %v45_v4  ;;  %192 = vmatpush.msra.mxu3 %v45_v4  ;;  %v199_v28 = vld [vmem:[%s359_s6] ss:$0 sm:$0xff] }
   0xe   :  { %183 = vmatmul.msk.f32.vlgmr.msra.gmra.mxu0 %vm53_vm0, %v43_v5  ;;  %184 = vmatmul.msk.f32.vlgmr.msra.gmra.mxu3 %vm53_vm0, %v44_v6 }
   0xf   :  { %114 = vmatpush.msra.mxu1 %v85_v9  ;;  %152 = vmatpush.msra.mxu2 %v125_v19 }
  0x11   :  { %153 = vmatpush.msra.mxu2 %v124_v20 }
  0x8b   :  { %v77_v12 = vpop.f32.mrf.mxu0 }
  0x8c   :  { %v78_v13 = vadd.f32 %v197_v11, %v77_v12 }
  0x8e   :  { %v83_v14 = vmax.f32 %v78_v13, 0.0 }
  0x90   :  { %185 = vmatmul.msk.f32.vlgmr.msra.gmra.mxu1 %vm53_vm0, %v83_v14 }
  0x91   :  { %v80_v15 = vpop.f32.mrf.mxu3 }
  0x92   :  { %v81_v16 = vadd.f32 %v197_v11, %v80_v15 }
  0x94   :  { %v84_v17 = vmax.f32 %v81_v16, 0.0 }
  0x98   :  { %186 = vmatmul.msk.f32.gmra.mxu1 %vm53_vm0, %v84_v17 }
 0x10d   :  { %v116_v22 = vpop.f32.mrf.mxu1 }
 0x10e   :  { %v117_v23 = vadd.f32 %v198_v21, %v116_v22 }
 0x110   :  { %v122_v24 = vadd.f32 %v117_v23, %v43_v5 }
 0x112   :  { %187 = vmatmul.msk.f32.vlgmr.msra.gmra.mxu2 %vm53_vm0, %v122_v24 }
 0x115   :  { %v119_v25 = vpop.f32.mrf.mxu1 }
 0x116   :  { %v120_v26 = vadd.f32 %v198_v21, %v119_v25 }
 0x118   :  { %v123_v27 = vadd.f32 %v120_v26, %v44_v6 }
 0x11a   :  { %188 = vmatmul.msk.f32.gmra.mxu2 %vm53_vm0, %v123_v27 }
 0x195   :  { %v155_v29 = vpop.f32.mrf.mxu2 }
 0x196   :  { %v156_v30 = vadd.f32 %v199_v28, %v155_v29 }
 0x198   :  { %162 = vst.msk [vmem:[#allocation5] sm:$0xff] %vm161_vm1, %v156_v30 }
 0x19d   :  { %v158_v31 = vpop.f32.mrf.mxu2 }
 0x19e   :  { %v159_v32 = vadd.f32 %v199_v28, %v158_v31 }
 0x1a0   :  { %163 = vst.msk [vmem:[#allocation5 + $0x8] sm:$0xff] %vm161_vm1, %v159_v32 }
 0x1a1   :  { %176 = dma.vmem_to_hbm [thread:$0]  %s169_s4, 256, %s171_s11, [#allocation4], %s253_s29, %s253_s29, %s254_s30  }
 0x1a2   :  { %250 = dma.done.wait [#allocation4], 256  }
 0x1a3   :  { %251 = vsyncadd [#allocation4], 4294967040 }
 0x1a4   :  { %181 = vsyncpa [#allocation3], 1 }
 0x1a5   :  { %182 = vsyncpa [#allocation4], 1 }

// kernel: tpu_custom_call.1
= control target key start
LH: loop header
LB: loop body
LE: loop exit
PB: predicated region body
PF: predicated region fallthrough
CT: control target
= control target key end

     0   :  { %12 = vsyncpa [#allocation3], 0  ;;  %s353_s0 = inlined_call_operand.vmem [shape: f32[16,32], index: 0, kind: input, shape index: {}]   ;;  %s354_s1 = inlined_call_operand.vmem [shape: f32[32,32], index: 1, kind: input, shape index: {}]   ;;  %s355_s2 = inlined_call_operand.vmem [shape: f32[1,32], index: 2, kind: input, shape index: {}]   ;;  %s356_s3 = inlined_call_operand.hbm [shape: f32[32,32], index: 3, kind: input, shape index: {}]   ;;  %s357_s4 = inlined_call_operand.vmem [shape: f32[1,32], index: 4, kind: input, shape index: {}]   ;;  %s358_s5 = inlined_call_operand.vmem [shape: f32[32,16], index: 5, kind: input, shape index: {}]   ;;  %s359_s6 = inlined_call_operand.vmem [shape: f32[1,16], index: 6, kind: input, shape index: {}]   ;;  %s360_s7 = inlined_call_operand.hbm [shape: f32[16,16], index: 7, kind: output, shape index: {}]  }
   0x1   :  { %13 = vsyncpa [#allocation4], 0  ;;  %s24_s26 = sshll.u32 %s356_s3, 4  ;;  %s252_s27 = smov [#allocation2]   ;;  %s25_s26 = int_to_ptr.hbm [resolvable:$true] %s24_s26 }
   0x2   :  { %s26_s28 = sshll.u32 %s252_s27, 4  ;;  %s253_s29 = smov 128   ;;  %s27_s28 = int_to_ptr.vmem [resolvable:$true] %s26_s28 }
   0x3   :  { %s254_s30 = smov 8  }
   0x4   :  { %32 = dma.hbm_to_vmem [thread:$0]  %s25_s26, 512, %s27_s28, [#allocation3], %s253_s29, %s253_s29, %s254_s30  }
   0x5   :  { %248 = dma.done.wait [#allocation3], 512  }
   0x6   :  { %249 = vsyncadd [#allocation3], 4294966784  ;;  %v48_v0 = vld [vmem:[%s354_s1 + $0x18] sm:$0xff]  ;;  %v47_v1 = vld [vmem:[%s354_s1 + $0x10] sm:$0xff]  ;;  %vm53_vm0 = vcmask 261120   ;;  %vm161_vm1 = vcmask 130048  }
   0x7   :  { %72 = vmatpush.msra.mxu0 %v48_v0  ;;  %189 = vmatpush.msra.mxu3 %v48_v0  ;;  %v46_v2 = vld [vmem:[%s354_s1 + $0x8] sm:$0xff]  ;;  %v88_v3 = vld [vmem:[#allocation2 + $0x18] sm:$0xff]  ;;  %v45_v4 = vld [vmem:[%s354_s1] sm:$0xff]  ;;  %s170_s11 = sshll.u32 %s360_s7, 4  ;;  %s171_s11 = int_to_ptr.hbm [resolvable:$true] %s170_s11 }
   0x8   :  { %111 = vmatpush.msra.mxu1 %v88_v3  ;;  %v43_v5 = vld [vmem:[%s353_s0] sm:$0xff]  ;;  %v44_v6 = vld [vmem:[%s353_s0 + $0x8] sm:$0xff]  ;;  %v87_v7 = vld [vmem:[#allocation2 + $0x10] sm:$0xff] }
   0x9   :  { %73 = vmatpush.msra.mxu0 %v47_v1  ;;  %190 = vmatpush.msra.mxu3 %v47_v1  ;;  %v86_v8 = vld [vmem:[#allocation2 + $0x8] sm:$0xff]  ;;  %v85_v9 = vld [vmem:[#allocation2] sm:$0xff]  ;;  %v127_v10 = vld [vmem:[%s358_s5 + $0x18] sm:$0xff] }
   0xa   :  { %112 = vmatpush.msra.mxu1 %v87_v7  ;;  %150 = vmatpush.msra.mxu2 %v127_v10  ;;  %v197_v11 = vld [vmem:[%s355_s2] ss:$0 sm:$0xff]  ;;  %v126_v18 = vld [vmem:[%s358_s5 + $0x10] sm:$0xff]  ;;  %v125_v19 = vld [vmem:[%s358_s5 + $0x8] sm:$0xff] }
   0xb   :  { %74 = vmatpush.msra.mxu0 %v46_v2  ;;  %191 = vmatpush.msra.mxu3 %v46_v2  ;;  %v124_v20 = vld [vmem:[%s358_s5] sm:$0xff]  ;;  %s255_s5 = smov [#allocation5]  }
   0xc   :  { %113 = vmatpush.msra.mxu1 %v86_v8  ;;  %151 = vmatpush.msra.mxu2 %v126_v18  ;;  %v198_v21 = vld [vmem:[%s357_s4] ss:$0 sm:$0xff]  ;;  %s168_s4 = sshll.u32 %s255_s5, 4  ;;  %s169_s4 = int_to_ptr.vmem [resolvable:$true] %s168_s4 }
   0xd   :  { %75 = vmatpush.msra.mxu0 %v45_v4  ;;  %192 = vmatpush.msra.mxu3 %v45_v4  ;;  %v199_v28 = vld [vmem:[%s359_s6] ss:$0 sm:$0xff] }
   0xe   :  { %183 = vmatmul.msk.f32.vlgmr.msra.gmra.mxu0 %vm53_vm0, %v43_v5  ;;  %184 = vmatmul.msk.f32.vlgmr.msra.gmra.mxu3 %vm53_vm0, %v44_v6 }
   0xf   :  { %114 = vmatpush.msra.mxu1 %v85_v9  ;;  %152 = vmatpush.msra.mxu2 %v125_v19 }
  0x11   :  { %153 = vmatpush.msra.mxu2 %v124_v20 }
  0x8b   :  { %v77_v12 = vpop.f32.mrf.mxu0 }
  0x8c   :  { %v78_v13 = vadd.f32 %v197_v11, %v77_v12 }
  0x8e   :  { %v83_v14 = vmax.f32 %v78_v13, 0.0 }
  0x90   :  { %185 = vmatmul.msk.f32.vlgmr.msra.gmra.mxu1 %vm53_vm0, %v83_v14 }
  0x91   :  { %v80_v15 = vpop.f32.mrf.mxu3 }
  0x92   :  { %v81_v16 = vadd.f32 %v197_v11, %v80_v15 }
  0x94   :  { %v84_v17 = vmax.f32 %v81_v16, 0.0 }
  0x98   :  { %186 = vmatmul.msk.f32.gmra.mxu1 %vm53_vm0, %v84_v17 }
 0x10d   :  { %v116_v22 = vpop.f32.mrf.mxu1 }
 0x10e   :  { %v117_v23 = vadd.f32 %v198_v21, %v116_v22 }
 0x110   :  { %v122_v24 = vadd.f32 %v117_v23, %v43_v5 }
 0x112   :  { %187 = vmatmul.msk.f32.vlgmr.msra.gmra.mxu2 %vm53_vm0, %v122_v24 }
 0x115   :  { %v119_v25 = vpop.f32.mrf.mxu1 }
 0x116   :  { %v120_v26 = vadd.f32 %v198_v21, %v119_v25 }
 0x118   :  { %v123_v27 = vadd.f32 %v120_v26, %v44_v6 }
 0x11a   :  { %188 = vmatmul.msk.f32.gmra.mxu2 %vm53_vm0, %v123_v27 }
 0x195   :  { %v155_v29 = vpop.f32.mrf.mxu2 }
 0x196   :  { %v156_v30 = vadd.f32 %v199_v28, %v155_v29 }
 0x198   :  { %162 = vst.msk [vmem:[#allocation5] sm:$0xff] %vm161_vm1, %v156_v30 }
 0x19d   :  { %v158_v31 = vpop.f32.mrf.mxu2 }
 0x19e   :  { %v159_v32 = vadd.f32 %v199_v28, %v158_v31 }
 0x1a0   :  { %163 = vst.msk [vmem:[#allocation5 + $0x8] sm:$0xff] %vm161_vm1, %v159_v32 }
 0x1a1   :  { %176 = dma.vmem_to_hbm [thread:$0]  %s169_s4, 256, %s171_s11, [#allocation4], %s253_s29, %s253_s29, %s254_s30  }
 0x1a2   :  { %250 = dma.done.wait [#allocation4], 256  }
 0x1a3   :  { %251 = vsyncadd [#allocation4], 4294967040 }
 0x1a4   :  { %181 = vsyncpa [#allocation3], 1 }
 0x1a5   :  { %182 = vsyncpa [#allocation4], 1 }

</bundles_post_ra>
